<compile_context>
chip_gen: v6e
topology: v6e:2x2x1
jax: 0.10.0
libtpu: 0.0.40
codegen_flags: <defaults>
</compile_context>

<pallas_src>
import math

import jax
import jax.numpy as jnp
from jax.experimental import pallas as pl
from jax.experimental.pallas import tpu as pltpu


# ----------------------------------------------------------------------------
# Fused 2-layer GraphConv kernel.
# One grid step computes the full layer 0 plus one row-tile of layer 1:
#   out_tile = (A1_tile @ relu((A0 @ X) @ W0 + b0)) @ W1 + b1
# ----------------------------------------------------------------------------
def fused_sage_kernel(a0_ref, x_ref, w0_ref, b0_ref,
                      a1_ref, w1_ref, b1_ref, o_ref):
    bf16 = jnp.bfloat16

    # ----- Layer 0: copy_u + sum aggregation, Linear, ReLU ------------------
    # In-kernel bf16 casts (VPU work hidden under MXU pushes); f32 accumulation.
    agg0 = jnp.dot(a0_ref[...].astype(bf16), x_ref[...].astype(bf16),
                   preferred_element_type=jnp.float32)
    h0 = jnp.dot(agg0.astype(bf16), w0_ref[...].astype(bf16),
                 preferred_element_type=jnp.float32)
    h0 = jnp.maximum(h0 + b0_ref[...], 0.0)        # bias + relu in f32 (v5e-safe)
    # TODO(synk): dropout is identity here (eval mode); no RNG-matched dropout.
    h0_bf = h0.astype(bf16)                        # stays in vregs, no VMEM scratch

    # ----- Layer 1: aggregation + Linear (no activation on last layer) ------
    agg1 = jnp.dot(a1_ref[...].astype(bf16), h0_bf,
                   preferred_element_type=jnp.float32)
    out = jnp.dot(agg1.astype(bf16), w1_ref[...].astype(bf16),
                  preferred_element_type=jnp.float32)
    o_ref[...] = (out + b1_ref[...]).astype(o_ref.dtype)


def sage_forward(blocks, h, params, *, row_tile=256):
    """Fused SAGEModel forward (num_layers == 2).

    blocks: [A0 (n_dst0, n_src0), A1 (n_dst1, n_dst0)]  dense block adjacencies
    h:      (n_src0, in_size) node features, f32
    params: [(W0 (in, hid), b0 (1, hid)), (W1 (hid, out), b1 (1, out))]  f32
    returns (n_dst1, out_size) f32
    """
    a0, a1 = blocks
    (w0, b0), (w1, b1) = params
    n_dst0, n_src0 = a0.shape
    n_dst1, n_src1 = a1.shape
    in_size = h.shape[1]
    hid_size = w0.shape[1]
    out_size = w1.shape[1]
    assert n_src1 == n_dst0, "block 1 src nodes must be block 0 dst nodes"

    # Row-tile over final dst nodes; "parallel" so megacore can shard it.
    # TODO(synk): at scale, layer 0 is recomputed per row-tile and the whole
    # problem sits in VMEM; split per-layer with (dst, src) tiling + an
    # 'arbitrary' K-reduction axis (and a CSR gather path), sized for v7x's
    # 64 MiB VMEM (half the v5e/v6e tile budget).
    tm = min(row_tile, n_dst1)
    grid = (pl.cdiv(n_dst1, tm),)

    flops = 2 * (n_dst0 * n_src0 * in_size
                 + n_dst0 * in_size * hid_size
                 + n_dst1 * n_dst0 * hid_size
                 + n_dst1 * hid_size * out_size)
    bytes_accessed = 4 * (a0.size + h.size + w0.size + b0.size
                          + a1.size + w1.size + b1.size + n_dst1 * out_size)

    return pl.pallas_call(
        fused_sage_kernel,
        out_shape=jax.ShapeDtypeStruct((n_dst1, out_size), jnp.float32),
        grid=grid,
        in_specs=[
            pl.BlockSpec((n_dst0, n_src0), lambda i: (0, 0)),    # A0 (broadcast)
            pl.BlockSpec((n_src0, in_size), lambda i: (0, 0)),   # X  (broadcast)
            pl.BlockSpec((in_size, hid_size), lambda i: (0, 0)), # W0
            pl.BlockSpec((1, hid_size), lambda i: (0, 0)),       # b0
            pl.BlockSpec((tm, n_src1), lambda i: (i, 0)),        # A1 row tile
            pl.BlockSpec((hid_size, out_size), lambda i: (0, 0)),# W1
            pl.BlockSpec((1, out_size), lambda i: (0, 0)),       # b1
        ],
        out_specs=pl.BlockSpec((tm, out_size), lambda i: (i, 0)),
        compiler_params=pltpu.CompilerParams(
            dimension_semantics=("parallel",)),
        cost_estimate=pl.CostEstimate(flops=flops, transcendentals=0,
                                      bytes_accessed=bytes_accessed),
    )(a0, h, w0, b0, a1, w1, b1)


# ----------------------------------------------------------------------------
# Plain-JAX references
# ----------------------------------------------------------------------------
def sage_reference_bf16(blocks, h, params):
    """Mirrors the kernel's exact mixed-precision math (tight cross-check)."""
    a0, a1 = blocks
    (w0, b0), (w1, b1) = params
    bf16 = jnp.bfloat16
    agg0 = jnp.dot(a0.astype(bf16), h.astype(bf16),
                   preferred_element_type=jnp.float32)
    h0 = jnp.dot(agg0.astype(bf16), w0.astype(bf16),
                 preferred_element_type=jnp.float32) + b0
    h0 = jnp.maximum(h0, 0.0).astype(bf16)
    agg1 = jnp.dot(a1.astype(bf16), h0, preferred_element_type=jnp.float32)
    out = jnp.dot(agg1.astype(bf16), w1.astype(bf16),
                  preferred_element_type=jnp.float32) + b1
    return out


def sage_reference_f32(blocks, h, params):
    """Original full-precision semantics (loose sanity check for bf16 path)."""
    a0, a1 = blocks
    (w0, b0), (w1, b1) = params
    h0 = jnp.maximum((a0 @ h) @ w0 + b0, 0.0)
    return (a1 @ h0) @ w1 + b1


# ----------------------------------------------------------------------------
# Deterministic parameter init (mimics nn.Linear default kaiming-uniform bounds)
# ----------------------------------------------------------------------------
def init_linear(key, f_in, f_out):
    kw, kb = jax.random.split(key)
    bound = 1.0 / math.sqrt(f_in)
    w = jax.random.uniform(kw, (f_in, f_out), jnp.float32, -bound, bound)
    b = jax.random.uniform(kb, (1, f_out), jnp.float32, -bound, bound)
    return w, b


if __name__ == "__main__":
    key = jax.random.PRNGKey(0)
    k_feat, k_a0, k_a1, k_w0, k_w1 = jax.random.split(key, 5)

    in_size, hid_size, out_size = 16, 32, 8
    n_src0, n_dst0 = 32, 16      # block 0: 32 src nodes -> 16 dst nodes
    n_src1, n_dst1 = 16, 8       # block 1: 16 src nodes -> 8 dst nodes

    # Input node features h: (n_src0, in_size)
    h = jax.random.normal(k_feat, (n_src0, in_size), jnp.float32)

    # Dense binary adjacencies for the two message-passing blocks.
    a0 = (jax.random.uniform(k_a0, (n_dst0, n_src0)) < 0.3).astype(jnp.float32)
    a1 = (jax.random.uniform(k_a1, (n_dst1, n_src1)) < 0.3).astype(jnp.float32)
    blocks = [a0, a1]

    # Layer parameters: GraphConv(in->hid), GraphConv(hid->out).
    params = [
        init_linear(k_w0, in_size, hid_size),
        init_linear(k_w1, hid_size, out_size),
    ]

    out = sage_forward(blocks, h, params)
    out = jax.block_until_ready(out)
    assert out.shape == (n_dst1, out_size)

    # Tight check: kernel matches a plain-JAX mirror of the same bf16/f32 math.
    ref_bf16 = sage_reference_bf16(blocks, h, params)
    assert jnp.allclose(out, ref_bf16, atol=1e-3, rtol=1e-3), (
        jnp.max(jnp.abs(out - ref_bf16)))

    # Loose check: bf16 MXU path stays close to the full-f32 forward semantics.
    ref_f32 = sage_reference_f32(blocks, h, params)
    assert jnp.allclose(out, ref_f32, atol=0.5, rtol=0.1), (
        jnp.max(jnp.abs(out - ref_f32)))

    print("KERNEL_OK")
</pallas_src>

<mosaic_0001>
module attributes {stable_mosaic.version = 11 : i64} {
  func.func @fused_sage_kernel(%arg0: i32, %arg1: memref<16x32xf32, #tpu.memory_space<vmem>>, %arg2: memref<32x16xf32, #tpu.memory_space<vmem>>, %arg3: memref<16x32xf32, #tpu.memory_space<vmem>>, %arg4: memref<1x32xf32, #tpu.memory_space<vmem>>, %arg5: memref<8x16xf32, #tpu.memory_space<vmem>>, %arg6: memref<32x8xf32, #tpu.memory_space<vmem>>, %arg7: memref<1x8xf32, #tpu.memory_space<vmem>>, %arg8: memref<8x8xf32, #tpu.memory_space<vmem>>) attributes {dimension_semantics = [#tpu.dimension_semantics<parallel>], iteration_bounds = array<i64: 1>, scalar_prefetch = 0 : i64, scratch_operands = 0 : i64, tpu.core_type = #tpu.core_type<tc>, window_params = [{pipeline_mode = #tpu.pipeline_mode<synchronous>, transform_indices = @transform_0, window_bounds = array<i64: 16, 32>}, {pipeline_mode = #tpu.pipeline_mode<synchronous>, transform_indices = @transform_1, window_bounds = array<i64: 32, 16>}, {pipeline_mode = #tpu.pipeline_mode<synchronous>, transform_indices = @transform_2, window_bounds = array<i64: 16, 32>}, {pipeline_mode = #tpu.pipeline_mode<synchronous>, transform_indices = @transform_3, window_bounds = array<i64: 1, 32>}, {transform_indices = @transform_4, window_bounds = array<i64: 8, 16>}, {pipeline_mode = #tpu.pipeline_mode<synchronous>, transform_indices = @transform_5, window_bounds = array<i64: 32, 8>}, {pipeline_mode = #tpu.pipeline_mode<synchronous>, transform_indices = @transform_6, window_bounds = array<i64: 1, 8>}, {transform_indices = @transform_7, window_bounds = array<i64: 8, 8>}]} {
    %c0 = arith.constant 0 : index
    %c0_0 = arith.constant 0 : index
    %0 = vector.load %arg1[%c0, %c0_0] : memref<16x32xf32, #tpu.memory_space<vmem>>, vector<16x32xf32>
    %1 = arith.truncf %0 : vector<16x32xf32> to vector<16x32xbf16>
    %c0_1 = arith.constant 0 : index
    %c0_2 = arith.constant 0 : index
    %2 = vector.load %arg2[%c0_1, %c0_2] : memref<32x16xf32, #tpu.memory_space<vmem>>, vector<32x16xf32>
    %3 = arith.truncf %2 : vector<32x16xf32> to vector<32x16xbf16>
    %cst = arith.constant dense<0.000000e+00> : vector<16x16xf32>
    %4 = tpu.matmul %1, %3, %cst {dimension_numbers = #tpu.dot_dimension_numbers<[1], [0], [0], [1], [0, 0, 1, 1], [], []>} : vector<16x32xbf16>, vector<32x16xbf16>, vector<16x16xf32> -> vector<16x16xf32>
    %5 = arith.truncf %4 : vector<16x16xf32> to vector<16x16xbf16>
    %c0_3 = arith.constant 0 : index
    %c0_4 = arith.constant 0 : index
    %6 = vector.load %arg3[%c0_3, %c0_4] : memref<16x32xf32, #tpu.memory_space<vmem>>, vector<16x32xf32>
    %7 = arith.truncf %6 : vector<16x32xf32> to vector<16x32xbf16>
    %cst_5 = arith.constant dense<0.000000e+00> : vector<16x32xf32>
    %8 = tpu.matmul %5, %7, %cst_5 {dimension_numbers = #tpu.dot_dimension_numbers<[1], [0], [0], [1], [0, 0, 1, 1], [], []>} : vector<16x16xbf16>, vector<16x32xbf16>, vector<16x32xf32> -> vector<16x32xf32>
    %c0_6 = arith.constant 0 : index
    %c0_7 = arith.constant 0 : index
    %9 = vector.load %arg4[%c0_6, %c0_7] : memref<1x32xf32, #tpu.memory_space<vmem>>, vector<1x32xf32>
    %10 = vector.broadcast %9 : vector<1x32xf32> to vector<16x32xf32>
    %11 = arith.addf %8, %10 : vector<16x32xf32>
    %cst_8 = arith.constant 0.000000e+00 : f32
    %12 = vector.broadcast %cst_8 : f32 to vector<16x32xf32>
    %13 = arith.maximumf %11, %12 : vector<16x32xf32>
    %14 = arith.truncf %13 : vector<16x32xf32> to vector<16x32xbf16>
    %c0_9 = arith.constant 0 : index
    %c0_10 = arith.constant 0 : index
    %15 = vector.load %arg5[%c0_9, %c0_10] : memref<8x16xf32, #tpu.memory_space<vmem>>, vector<8x16xf32>
    %16 = arith.truncf %15 : vector<8x16xf32> to vector<8x16xbf16>
    %cst_11 = arith.constant dense<0.000000e+00> : vector<8x32xf32>
    %17 = tpu.matmul %16, %14, %cst_11 {dimension_numbers = #tpu.dot_dimension_numbers<[1], [0], [0], [1], [0, 0, 1, 1], [], []>} : vector<8x16xbf16>, vector<16x32xbf16>, vector<8x32xf32> -> vector<8x32xf32>
    %18 = arith.truncf %17 : vector<8x32xf32> to vector<8x32xbf16>
    %c0_12 = arith.constant 0 : index
    %c0_13 = arith.constant 0 : index
    %19 = vector.load %arg6[%c0_12, %c0_13] : memref<32x8xf32, #tpu.memory_space<vmem>>, vector<32x8xf32>
    %20 = arith.truncf %19 : vector<32x8xf32> to vector<32x8xbf16>
    %cst_14 = arith.constant dense<0.000000e+00> : vector<8x8xf32>
    %21 = tpu.matmul %18, %20, %cst_14 {dimension_numbers = #tpu.dot_dimension_numbers<[1], [0], [0], [1], [0, 0, 1, 1], [], []>} : vector<8x32xbf16>, vector<32x8xbf16>, vector<8x8xf32> -> vector<8x8xf32>
    %c0_15 = arith.constant 0 : index
    %c0_16 = arith.constant 0 : index
    %22 = vector.load %arg7[%c0_15, %c0_16] : memref<1x8xf32, #tpu.memory_space<vmem>>, vector<1x8xf32>
    %23 = vector.broadcast %22 : vector<1x8xf32> to vector<8x8xf32>
    %24 = arith.addf %21, %23 : vector<8x8xf32>
    %c0_17 = arith.constant 0 : index
    %c0_18 = arith.constant 0 : index
    %25 = vector.load %arg8[%c0_17, %c0_18] : memref<8x8xf32, #tpu.memory_space<vmem>>, vector<8x8xf32>
    tpu.vector_store %arg8[%c0_17, %c0_18], %24 {strides = array<i32>} : memref<8x8xf32, #tpu.memory_space<vmem>>, vector<8x8xf32>,
    return
  }
  func.func @transform_0(%arg0: i32) -> (i32, i32) {
    %c0_i32 = arith.constant 0 : i32
    %c0_i32_0 = arith.constant 0 : i32
    %c0_i32_1 = arith.constant 0 : i32
    return %c0_i32, %c0_i32_0 : i32, i32
  }
  func.func @transform_1(%arg0: i32) -> (i32, i32) {
    %c0_i32 = arith.constant 0 : i32
    %c0_i32_0 = arith.constant 0 : i32
    %c0_i32_1 = arith.constant 0 : i32
    return %c0_i32, %c0_i32_0 : i32, i32
  }
  func.func @transform_2(%arg0: i32) -> (i32, i32) {
    %c0_i32 = arith.constant 0 : i32
    %c0_i32_0 = arith.constant 0 : i32
    %c0_i32_1 = arith.constant 0 : i32
    return %c0_i32, %c0_i32_0 : i32, i32
  }
  func.func @transform_3(%arg0: i32) -> (i32, i32) {
    %c0_i32 = arith.constant 0 : i32
    %c0_i32_0 = arith.constant 0 : i32
    %c0_i32_1 = arith.constant 0 : i32
    return %c0_i32, %c0_i32_0 : i32, i32
  }
  func.func @transform_4(%arg0: i32) -> (i32, i32) {
    %c0_i32 = arith.constant 0 : i32
    %c0_i32_0 = arith.constant 0 : i32
    return %arg0, %c0_i32 : i32, i32
  }
  func.func @transform_5(%arg0: i32) -> (i32, i32) {
    %c0_i32 = arith.constant 0 : i32
    %c0_i32_0 = arith.constant 0 : i32
    %c0_i32_1 = arith.constant 0 : i32
    return %c0_i32, %c0_i32_0 : i32, i32
  }
  func.func @transform_6(%arg0: i32) -> (i32, i32) {
    %c0_i32 = arith.constant 0 : i32
    %c0_i32_0 = arith.constant 0 : i32
    %c0_i32_1 = arith.constant 0 : i32
    return %c0_i32, %c0_i32_0 : i32, i32
  }
  func.func @transform_7(%arg0: i32) -> (i32, i32) {
    %c0_i32 = arith.constant 0 : i32
    %c0_i32_0 = arith.constant 0 : i32
    return %arg0, %c0_i32 : i32, i32
  }
}

</mosaic_0001>

<bundles_post_ra>
// kernel: tpu_custom_call.1
= control target key start
LH: loop header
LB: loop body
LE: loop exit
PB: predicated region body
PF: predicated region fallthrough
CT: control target
= control target key end

     0   :  { %v328_v3 = vmov 0.0   ;;  %vm329_vm0 = vmmov 0   ;;  %s427_s0 = inlined_call_operand.vmem [shape: f32[16,32], index: 0, kind: input, shape index: {}]   ;;  %s428_s1 = inlined_call_operand.vmem [shape: f32[32,16], index: 1, kind: input, shape index: {}]   ;;  %s429_s2 = inlined_call_operand.vmem [shape: f32[16,32], index: 2, kind: input, shape index: {}]   ;;  %s430_s3 = inlined_call_operand.vmem [shape: f32[1,32], index: 3, kind: input, shape index: {}]   ;;  %s431_s4 = inlined_call_operand.vmem [shape: f32[8,16], index: 4, kind: input, shape index: {}]   ;;  %s432_s5 = inlined_call_operand.vmem [shape: f32[32,8], index: 5, kind: input, shape index: {}]   ;;  %s433_s6 = inlined_call_operand.vmem [shape: f32[1,8], index: 6, kind: input, shape index: {}]   ;;  %s434_s7 = inlined_call_operand.hbm [shape: f32[8,8], index: 7, kind: output, shape index: {}]  }
   0x1   :  { %v33_v0 = vld [vmem:[%s428_s1 + $0x10] sm:$0xff]  ;;  %v34_v1 = vld [vmem:[%s428_s1 + $0x18] sm:$0xff]  ;;  %v31_v2 = vld [vmem:[%s428_s1] sm:$0xff]  ;;  %275 = vmatprep.subr.bf16.mxu0 %v328_v3  ;;  %279 = vmatprep.mubr.msk.bf16.mxu0 %vm329_vm0, %v328_v3 }
   0x2   :  { %v36_v4 = vpack.c.bf16 %v34_v1, %v33_v0  ;;  %v32_v5 = vld [vmem:[%s428_s1 + $0x8] sm:$0xff]  ;;  %283 = vmatprep.subr.bf16.mxu1 %v328_v3  ;;  %285 = vmatprep.mubr.msk.bf16.mxu1 %vm329_vm0, %v328_v3 }
   0x3   :  { %12 = vsyncpa [#allocation3], 0  ;;  %v35_v6 = vpack.c.bf16 %v32_v5, %v31_v2  ;;  %v28_v7 = vld [vmem:[%s427_s0] sm:$0xff]  ;;  %v29_v8 = vld [vmem:[%s427_s0 + $0x8] sm:$0xff]  ;;  %vm37_vm1 = vcmask 261120   ;;  %vm93_vm2 = vcmask 130048  }
   0x4   :  { %276 = vmatpush3.bf16.msra.mxu0 %v36_v4  ;;  %v30_v9 = vpack.c.bf16 %v29_v8, %v28_v7  ;;  %v83_v10 = vld [vmem:[%s429_s2] sm:$0xff]  ;;  %v84_v11 = vld [vmem:[%s429_s2 + $0x8] sm:$0xff]  ;;  %v189_v18 = vld [vmem:[%s432_s5 + $0x10] sm:$0xff]  ;;  %s330_s26 = smov [#allocation2]   ;;  %vm243_vm3 = vcmask 64512  }
   0x5   :  { %277 = vmatprep.subr.bf16.mxu0 %v328_v3  ;;  %v85_v12 = vpack.c.bf16 %v84_v11, %v83_v10  ;;  %v190_v19 = vld [vmem:[%s432_s5 + $0x18] sm:$0xff]  ;;  %v260_v21 = vld [vmem:[%s430_s3] ss:$0 sm:$0xff]  ;;  %v188_v34 = vld [vmem:[%s432_s5 + $0x8] sm:$0xff]  ;;  %s251_s27 = sshll.u32 %s330_s26, 4  ;;  %s252_s27 = int_to_ptr.vmem [resolvable:$true] %s251_s27 }
   0x6   :  { %v192_v20 = vpack.c.bf16 %v190_v19, %v189_v18  ;;  %v141_v30 = vld [vmem:[%s431_s4] sm:$0xff]  ;;  %p311_p1 = scmp.lt.s32.totalorder %s252_s27, %s252_s27 }
   0x7   :  { %284 = vmatpush3.bf16.msra.mxu1 %v85_v12  ;;  %v142_v32 = vpack.c.bf16 %v141_v30, %v141_v30  ;;  %v187_v33 = vld [vmem:[%s432_s5] sm:$0xff]  ;;  %s306_s5 = scalar_lea.vmem %s252_s27, 128 }
   0x8   :  { %278 = vmatpush3.bf16.msra.mxu0 %v35_v6  ;;  %289 = vmatprep.subr.bf16.mxu1 %v328_v3  ;;  %v191_v35 = vpack.c.bf16 %v188_v34, %v187_v33  ;;  %v263_v41 = vld [vmem:[%s433_s6] ss:$0 sm:$0xff]  ;;  %p307_p0 = scmp.ne.s32.totalorder %s252_s27, %s306_s5  ;;  %p312_p2 = scmp.lt.s32.totalorder %s306_s5, %s306_s5 }
   0x9   :  { %295 = vmatprep.subr.bf16.mxu0 %v328_v3 }
   0xa   :  { %p313_p3 = por %p312_p2, %p311_p1 }
   0xb   :  { %280 = vmatmul.mubr.msk.bf16.vlgmr.msra.gmra.mxu0 %vm37_vm1, %v30_v9 }
   0xc   :  { %299 = vmatprep.mubr.msk.bf16.mxu0 %vm329_vm0, %v328_v3  ;;  %296 = vmatpush3.bf16.msra.mxu0 %v192_v20  ;;  %p314_p4 = pnand %p313_p3, %p307_p0 }
   0xd   :  { %297 = vmatprep.subr.bf16.mxu0 %v328_v3 }
  0x10   :  { %298 = vmatpush3.bf16.msra.mxu0 %v191_v35 }
  0xcb   :  { %v75_v13 = vpop.f32.mrf.mxu0 }
  0xcd   :  { %v281_v14 = vpop.f32.mrf.mxu0 }
  0xcf   :  { %v78_v15 = vpop.f32.mrf.mxu0 }
  0xd0   :  { %v82_v16 = vpack.c.bf16 %v78_v15, %v75_v13 }
  0xd1   :  { %v282_v17 = vpop.f32.mrf.mxu0 }
  0xd2   :  { %286 = vmatmul.mubr.msk.bf16.vlgmr.msra.gmra.mxu1 %vm93_vm2, %v82_v16 }
  0xd3   :  { %291 = vmatprep.mubr.msk.bf16.mxu1 %vm329_vm0, %v328_v3 }
 0x192   :  { %v131_v22 = vpop.f32.mrf.mxu1 }
 0x193   :  { %v132_v24 = vadd.f32 %v260_v21, %v131_v22 }
 0x194   :  { %v287_v23 = vpop.f32.mrf.mxu1 }
 0x195   :  { %v138_v28 = vmax.f32 %v132_v24, 0.0 }
 0x196   :  { %v134_v25 = vpop.f32.mrf.mxu1 }
 0x197   :  { %v135_v26 = vadd.f32 %v260_v21, %v134_v25 }
 0x198   :  { %v288_v27 = vpop.f32.mrf.mxu1 }
 0x199   :  { %v139_v29 = vmax.f32 %v135_v26, 0.0 }
 0x19b   :  { %v140_v31 = vpack.c.bf16 %v139_v29, %v138_v28 }
 0x19d   :  { %290 = vmatpush3.bf16.msra.mxu1 %v140_v31 }
 0x1a0   :  { %292 = vmatmul.mubr.msk.bf16.vlgmr.msra.gmra.mxu1 %vm93_vm2, %v142_v32 }
 0x260   :  { %v180_v36 = vpop.f32.mrf.mxu1 }
 0x261   :  { %v186_v37 = vpack.c.bf16 %v180_v36, %v180_v36 }
 0x262   :  { %v293_v38 = vpop.f32.mrf.mxu1 }
 0x263   :  { %300 = vmatmul.mubr.msk.bf16.vlgmr.msra.gmra.mxu0 %vm37_vm1, %v186_v37 }
 0x264   :  { %v183_v39 = vpop.f32.mrf.mxu1 }
 0x266   :  { %v294_v40 = vpop.f32.mrf.mxu1 }
 0x323   :  { %v237_v42 = vpop.f32.mrf.mxu0 }
 0x324   :  { %v238_v43 = vadd.f32 %v263_v41, %v237_v42 }
 0x325   :  { %v301_v44 = vpop.f32.mrf.mxu0 }
 0x326   :  { %244 = vst.msk [vmem:[#allocation2] sm:$0xff] %vm243_vm3, %v238_v43 }
 0x327   :  { %v240_v45 = vpop.f32.mrf.mxu0 }
 0x328   :  { %317 = shalt.err (!%p314_p4)
}
 0x329   :  { %254 = dma.vmem_to_hbm [thread:$0]  %s252_s27, 128, %s434_s7, [#allocation3]   ;;  %v302_v46 = vpop.f32.mrf.mxu0 }
 0x32a   :  { %326 = dma.done.wait [#allocation3], 128  }
 0x32b   :  { %327 = vsyncadd [#allocation3], 4294967168 }
 0x32c   :  { %258 = vsyncpa [#allocation3], 1 }

</bundles_post_ra>
